<compile_context>
chip_gen: v7x
topology: tpu7x:2x2x1
jax: 0.10.0
libtpu: 0.0.40
codegen_flags: <defaults>
</compile_context>

<pallas_src>
import functools
import math

import jax
import jax.numpy as jnp
from jax.experimental import pallas as pl
from jax.experimental.pallas import tpu as pltpu


# ----------------------------------------------------------------------------- kernels

def _ln_f32(x, g, b):
    # LayerNorm over last dim, eps = 1e-5 (PyTorch default).  All math in f32.
    x = x.astype(jnp.float32)
    mu = jnp.mean(x, axis=-1, keepdims=True)
    var = jnp.mean((x - mu) ** 2, axis=-1, keepdims=True)
    return (x - mu) * jax.lax.rsqrt(var + 1e-5) * g.astype(jnp.float32) + b.astype(jnp.float32)


def _linear_kernel(x_ref, w_ref, b_ref, o_ref):
    # o = x @ W + b
    acc = jnp.dot(x_ref[...], w_ref[...], preferred_element_type=jnp.float32)
    o_ref[...] = (acc + b_ref[...]).astype(o_ref.dtype)


def _ln_matmul_kernel(x_ref, g_ref, bln_ref, w_ref, b_ref, o_ref):
    # o = LN(x) @ W + b   (LN fused into the matmul prologue)
    hn = _ln_f32(x_ref[...], g_ref[...], bln_ref[...])
    acc = jnp.dot(hn, w_ref[...], preferred_element_type=jnp.float32) + b_ref[...]
    o_ref[...] = acc.astype(o_ref.dtype)


def _linear_residual_kernel(x_ref, w_ref, b_ref, res_ref, o_ref):
    # o = residual + x @ W + b   (residual add fused into the epilogue)
    acc = jnp.dot(x_ref[...], w_ref[...], preferred_element_type=jnp.float32) + b_ref[...]
    o_ref[...] = (res_ref[...].astype(jnp.float32) + acc).astype(o_ref.dtype)


def _ln_mlp_residual_kernel(x_ref, g_ref, bln_ref, w1_ref, b1_ref, w2_ref, b2_ref, o_ref):
    # o = x + MLP(LN(x)),  MLP = Linear -> GELU -> Linear   (whole MLP sub-block fused)
    hn = _ln_f32(x_ref[...], g_ref[...], bln_ref[...])
    h = jnp.dot(hn, w1_ref[...], preferred_element_type=jnp.float32) + b1_ref[...]
    h = jax.nn.gelu(h)  # TODO(synk): activation inferred as GELU (MLP body not provided)
    o = jnp.dot(h, w2_ref[...], preferred_element_type=jnp.float32) + b2_ref[...]
    o_ref[...] = (x_ref[...].astype(jnp.float32) + o).astype(o_ref.dtype)


def _matmul_ln_kernel(x_ref, w_ref, b_ref, g_ref, bln_ref, o_ref):
    # o = LN(x @ W + b)   (final output projection with trailing LayerNorm fused)
    acc = jnp.dot(x_ref[...], w_ref[...], preferred_element_type=jnp.float32) + b_ref[...]
    o_ref[...] = _ln_f32(acc, g_ref[...], bln_ref[...]).astype(o_ref.dtype)


def _mha_kernel(qkv_ref, o_ref, w_ref, *, num_heads, scale, apply_mask):
    # One batch element per grid step. qkv block: (1, S, 3D) with layout [Q | K | V].
    # Heads are sliced in VMEM (no HBM head transposes).
    qkv = qkv_ref[0].astype(jnp.float32)          # (S, 3D)
    S, D3 = qkv.shape
    D = D3 // 3
    Dh = D // num_heads

    if apply_mask:
        row = jax.lax.broadcasted_iota(jnp.int32, (S, S), 0)
        col = jax.lax.broadcasted_iota(jnp.int32, (S, S), 1)
        causal = col <= row

    outs = []
    for h in range(num_heads):
        q = qkv[:, h * Dh:(h + 1) * Dh] * scale                 # scale folded into q
        k = qkv[:, D + h * Dh:D + (h + 1) * Dh]
        v = qkv[:, 2 * D + h * Dh:2 * D + (h + 1) * Dh]
        # scores: contract last dims directly (no k.T relayout)
        s = jax.lax.dot_general(q, k, (((1,), (1,)), ((), ())),
                                preferred_element_type=jnp.float32)   # (S, S)
        if apply_mask:
            s = jnp.where(causal, s, jnp.float32(-1e30))
        m = jnp.max(s, axis=-1, keepdims=True)
        p = jnp.exp(s - m)
        # exact reciprocal: attention weights are a user-visible output of the module
        p = p * pl.reciprocal(jnp.sum(p, axis=-1, keepdims=True), approx=False)
        w_ref[0, h] = p.astype(w_ref.dtype)
        outs.append(jnp.dot(p, v, preferred_element_type=jnp.float32))

    o_ref[0] = jnp.concatenate(outs, axis=-1).astype(o_ref.dtype)     # (S, D), lane-dense


# ----------------------------------------------------------------------------- wrappers

def _row_tile(n, pref=256):
    """Pick the token-tile size: prefer `pref`, else the largest multiple-of-8 divisor
    of n that still yields >=2 grid steps (so v7x megacore gets work), else n."""
    if n >= pref and n % pref == 0:
        return pref
    for cand in (128, 64, 32, 16, 8):
        if cand < n and n % cand == 0:
            return cand
    return n


def _tokens_call(kernel, args, row_arg_idx, out_dout):
    """Run `kernel` on 2D args tiled over the token (row) dimension.

    args           : list of 2D arrays (first row-tiled arg defines N).
    row_arg_idx    : indices of args tiled as (tm, cols); others are whole-array blocks
                     (weights / biases / LN params — last dims equal full array dims).
    out_dout       : output feature width.
    """
    N = args[row_arg_idx[0]].shape[0]
    tm = _row_tile(N)
    grid = (N // tm,)
    in_specs = []
    for idx, a in enumerate(args):
        if idx in row_arg_idx:
            in_specs.append(pl.BlockSpec((tm, a.shape[1]), lambda i: (i, 0)))
        else:
            in_specs.append(pl.BlockSpec(a.shape, lambda i: (0, 0)))
    return pl.pallas_call(
        kernel,
        out_shape=jax.ShapeDtypeStruct((N, out_dout), args[row_arg_idx[0]].dtype),
        grid=grid,
        in_specs=in_specs,
        out_specs=pl.BlockSpec((tm, out_dout), lambda i: (i, 0)),
        compiler_params=pltpu.CompilerParams(dimension_semantics=("parallel",)),
    )(*args)


def linear_proj(x2d, w, b):
    return _tokens_call(_linear_kernel, [x2d, w, b], (0,), w.shape[1])


def ln_qkv(x2d, g, bln, wqkv, bqkv):
    return _tokens_call(_ln_matmul_kernel, [x2d, g, bln, wqkv, bqkv], (0,), wqkv.shape[1])


def out_proj_residual(x2d, w, b, res2d):
    return _tokens_call(_linear_residual_kernel, [x2d, w, b, res2d], (0, 3), w.shape[1])


def ln_mlp_residual(x2d, g, bln, w1, b1, w2, b2):
    return _tokens_call(_ln_mlp_residual_kernel, [x2d, g, bln, w1, b1, w2, b2], (0,),
                        w2.shape[1])


def out_proj_norm(x2d, w, b, g, bln):
    return _tokens_call(_matmul_ln_kernel, [x2d, w, b, g, bln], (0,), w.shape[1])


def mha(qkv_bsd, *, num_heads, apply_mask):
    # qkv_bsd: (B, S, 3D) with columns [Q | K | V]; heads handled in-kernel.
    B, S, D3 = qkv_bsd.shape
    D = D3 // 3
    Dh = D // num_heads
    kernel = functools.partial(_mha_kernel, num_heads=num_heads,
                               scale=1.0 / math.sqrt(Dh), apply_mask=apply_mask)
    out, wts = pl.pallas_call(
        kernel,
        out_shape=(
            jax.ShapeDtypeStruct((B, S, D), qkv_bsd.dtype),
            jax.ShapeDtypeStruct((B, num_heads, S, S), jnp.float32),
        ),
        grid=(B,),
        in_specs=[pl.BlockSpec((1, S, D3), lambda b: (b, 0, 0))],
        out_specs=(
            pl.BlockSpec((1, S, D), lambda b: (b, 0, 0)),
            pl.BlockSpec((1, num_heads, S, S), lambda b: (b, 0, 0, 0)),
        ),
        compiler_params=pltpu.CompilerParams(dimension_semantics=("parallel",)),
    )(qkv_bsd)
    return out, wts
    # TODO(synk): for long sequences (S >~ 1-2K) switch to a KV-tiled online-softmax
    # (flash) kernel and make the full (B,H,S,S) weights output optional.


# ----------------------------------------------------------------------------- model

def init_params(key, *, input_dim, embedding_dim, ff_dim, num_layers, output_dim, max_seq_len):
    def dense(k, din, dout):
        kw, kb = jax.random.split(k)
        scale = 1.0 / math.sqrt(din)
        w = jax.random.uniform(kw, (din, dout), jnp.float32, -scale, scale)
        b = jax.random.uniform(kb, (1, dout), jnp.float32, -scale, scale)
        return w, b

    keys = jax.random.split(key, 3 + num_layers)
    params = {}
    params["proj_w"], params["proj_b"] = dense(keys[0], input_dim, embedding_dim)
    params["out_w"], params["out_b"] = dense(keys[1], embedding_dim, output_dim)
    params["norm_g"] = jnp.ones((1, output_dim), jnp.float32)
    params["norm_b"] = jnp.zeros((1, output_dim), jnp.float32)
    # Present in the PyTorch module but unused by its forward(); kept for parity.
    params["pos_embedding"] = jax.random.normal(
        keys[2], (1, max_seq_len, embedding_dim), jnp.float32)

    layers = []
    for li in range(num_layers):
        lk = jax.random.split(keys[3 + li], 6)
        lp = {}
        wq, bq = dense(lk[0], embedding_dim, embedding_dim)
        wk, bk = dense(lk[1], embedding_dim, embedding_dim)
        wv, bv = dense(lk[2], embedding_dim, embedding_dim)
        # Fused QKV projection: one (D, 3D) weight / (1, 3D) bias.
        lp["wqkv"] = jnp.concatenate([wq, wk, wv], axis=1)
        lp["bqkv"] = jnp.concatenate([bq, bk, bv], axis=1)
        lp["wo"], lp["bo"] = dense(lk[3], embedding_dim, embedding_dim)
        lp["w1"], lp["b1"] = dense(lk[4], embedding_dim, ff_dim)
        lp["w2"], lp["b2"] = dense(lk[5], ff_dim, embedding_dim)
        lp["ln1_g"] = jnp.ones((1, embedding_dim), jnp.float32)
        lp["ln1_b"] = jnp.zeros((1, embedding_dim), jnp.float32)
        lp["ln2_g"] = jnp.ones((1, embedding_dim), jnp.float32)
        lp["ln2_b"] = jnp.zeros((1, embedding_dim), jnp.float32)
        layers.append(lp)
    params["layers"] = layers
    return params


def decoder_forward(x, params, *, num_heads, apply_mask=True):
    # x: (B, S, input_dim)  ->  (out: (B, S, output_dim), [attn_weights (B, H, S, S)] * L)
    B, S, Din = x.shape
    D = params["proj_w"].shape[1]
    N = B * S

    h = linear_proj(x.reshape(N, Din), params["proj_w"], params["proj_b"])   # (N, D)

    all_attn = []
    for lp in params["layers"]:
        # --- self-attention sub-block: LN1 fused into QKV, residual fused into Wo ---
        qkv = ln_qkv(h, lp["ln1_g"], lp["ln1_b"], lp["wqkv"], lp["bqkv"])    # (N, 3D)
        attn_out, attn_w = mha(qkv.reshape(B, S, 3 * D),
                               num_heads=num_heads, apply_mask=apply_mask)
        all_attn.append(attn_w)
        h = out_proj_residual(attn_out.reshape(N, D), lp["wo"], lp["bo"], h)
        # --- MLP sub-block: LN2 + Linear + GELU + Linear + residual, fully fused ---
        h = ln_mlp_residual(h, lp["ln2_g"], lp["ln2_b"],
                            lp["w1"], lp["b1"], lp["w2"], lp["b2"])

    # --- output projection with trailing LayerNorm fused ---
    out = out_proj_norm(h, params["out_w"], params["out_b"],
                        params["norm_g"], params["norm_b"])
    return out.reshape(B, S, -1), all_attn


# ----------------------------------------------------------------------------- main

if __name__ == "__main__":
    # Small, forward-consistent shapes (output_dim == embedding_dim so the reference
    # module's trailing LayerNorm(embedding_dim) is well-formed).
    B, S = 2, 8
    INPUT_DIM = 64
    EMB = 32
    HEADS = 4
    FF = 64
    LAYERS = 2
    OUT_DIM = EMB
    MAX_SEQ = 100

    key = jax.random.PRNGKey(0)
    k_params, k_x = jax.random.split(key)
    params = init_params(
        k_params,
        input_dim=INPUT_DIM,
        embedding_dim=EMB,
        ff_dim=FF,
        num_layers=LAYERS,
        output_dim=OUT_DIM,
        max_seq_len=MAX_SEQ,
    )
    x = jax.random.normal(k_x, (B, S, INPUT_DIM), jnp.float32)

    out, attn_weights = decoder_forward(x, params, num_heads=HEADS, apply_mask=True)
    out = jax.block_until_ready(out)
    attn_weights = [jax.block_until_ready(a) for a in attn_weights]

    assert out.shape == (B, S, OUT_DIM), out.shape
    assert len(attn_weights) == LAYERS
    assert attn_weights[0].shape == (B, HEADS, S, S), attn_weights[0].shape
    # softmax rows sum to 1
    assert jnp.allclose(attn_weights[0].sum(-1), 1.0, atol=1e-5)
    # causal mask: strictly-upper-triangular weights are ~0
    upper = jnp.triu(jnp.ones((S, S), jnp.float32), k=1)
    assert float(jnp.max(jnp.abs(attn_weights[0] * upper))) < 1e-6
    assert bool(jnp.all(jnp.isfinite(out)))
    print("KERNEL_OK")
</pallas_src>

<mosaic_0001>
module attributes {stable_mosaic.version = 11 : i64} {
  func.func @_linear_kernel(%arg0: i32, %arg1: memref<8x64xf32, #tpu.memory_space<vmem>>, %arg2: memref<64x32xf32, #tpu.memory_space<vmem>>, %arg3: memref<1x32xf32, #tpu.memory_space<vmem>>, %arg4: memref<8x32xf32, #tpu.memory_space<vmem>>) attributes {dimension_semantics = [#tpu.dimension_semantics<parallel>], iteration_bounds = array<i64: 2>, scalar_prefetch = 0 : i64, scratch_operands = 0 : i64, tpu.core_type = #tpu.core_type<tc>, window_params = [{transform_indices = @transform_0, window_bounds = array<i64: 8, 64>}, {pipeline_mode = #tpu.pipeline_mode<synchronous>, transform_indices = @transform_1, window_bounds = array<i64: 64, 32>}, {pipeline_mode = #tpu.pipeline_mode<synchronous>, transform_indices = @transform_2, window_bounds = array<i64: 1, 32>}, {transform_indices = @transform_3, window_bounds = array<i64: 8, 32>}]} {
    %c0 = arith.constant 0 : index
    %c0_0 = arith.constant 0 : index
    %0 = vector.load %arg1[%c0, %c0_0] : memref<8x64xf32, #tpu.memory_space<vmem>>, vector<8x64xf32>
    %c0_1 = arith.constant 0 : index
    %c0_2 = arith.constant 0 : index
    %1 = vector.load %arg2[%c0_1, %c0_2] : memref<64x32xf32, #tpu.memory_space<vmem>>, vector<64x32xf32>
    %cst = arith.constant dense<0.000000e+00> : vector<8x32xf32>
    %2 = tpu.matmul %0, %1, %cst {dimension_numbers = #tpu.dot_dimension_numbers<[1], [0], [0], [1], [0, 0, 1, 1], [], []>} : vector<8x64xf32>, vector<64x32xf32>, vector<8x32xf32> -> vector<8x32xf32>
    %c0_3 = arith.constant 0 : index
    %c0_4 = arith.constant 0 : index
    %3 = vector.load %arg3[%c0_3, %c0_4] : memref<1x32xf32, #tpu.memory_space<vmem>>, vector<1x32xf32>
    %4 = vector.broadcast %3 : vector<1x32xf32> to vector<8x32xf32>
    %5 = arith.addf %2, %4 : vector<8x32xf32>
    %c0_5 = arith.constant 0 : index
    %c0_6 = arith.constant 0 : index
    %6 = vector.load %arg4[%c0_5, %c0_6] : memref<8x32xf32, #tpu.memory_space<vmem>>, vector<8x32xf32>
    tpu.vector_store %arg4[%c0_5, %c0_6], %5 {strides = array<i32>} : memref<8x32xf32, #tpu.memory_space<vmem>>, vector<8x32xf32>,
    return
  }
  func.func @transform_0(%arg0: i32) -> (i32, i32) {
    %c0_i32 = arith.constant 0 : i32
    %c0_i32_0 = arith.constant 0 : i32
    return %arg0, %c0_i32 : i32, i32
  }
  func.func @transform_1(%arg0: i32) -> (i32, i32) {
    %c0_i32 = arith.constant 0 : i32
    %c0_i32_0 = arith.constant 0 : i32
    %c0_i32_1 = arith.constant 0 : i32
    return %c0_i32, %c0_i32_0 : i32, i32
  }
  func.func @transform_2(%arg0: i32) -> (i32, i32) {
    %c0_i32 = arith.constant 0 : i32
    %c0_i32_0 = arith.constant 0 : i32
    %c0_i32_1 = arith.constant 0 : i32
    return %c0_i32, %c0_i32_0 : i32, i32
  }
  func.func @transform_3(%arg0: i32) -> (i32, i32) {
    %c0_i32 = arith.constant 0 : i32
    %c0_i32_0 = arith.constant 0 : i32
    return %arg0, %c0_i32 : i32, i32
  }
}

</mosaic_0001>

<bundles_post_ra>
// kernel: tpu_custom_call.1
= control target key start
LH: loop header
LB: loop body
LE: loop exit
PB: predicated region body
PF: predicated region fallthrough
CT: control target
= control target key end

     0   :  { %8 = vsyncpa [#allocation3], 0  ;;  %s640_s0 = inlined_call_operand.vmem [shape: f32[16,64], index: 0, kind: input, shape index: {}]   ;;  %s641_s1 = inlined_call_operand.vmem [shape: f32[64,32], index: 1, kind: input, shape index: {}]   ;;  %s642_s2 = inlined_call_operand.vmem [shape: f32[1,32], index: 2, kind: input, shape index: {}]   ;;  %s643_s3 = inlined_call_operand.hbm [shape: f32[16,32], index: 3, kind: output, shape index: {}]  }
   0x1   :  { %10 = vsyncpa [#allocation3 + $0x1], 0  ;;  %s513_s12 = smov 0   ;;  %s515_s13 = smov 0  }
   0x2   :  { %s517_s14 = smov 0   ;;  %s519_s15 = smov 0  }
   0x3 LB: > { %s534_s16 = sadd.s32 4294967295, %s487_s15   ;;  %s331_s17 = sadd.s32 4294967294, %s487_s15   ;;  %s487_s15 = sphi %s519_s15, %s649_s15   ;;  %s483_s14 = sphi %s517_s14, %s648_s14   ;;  %s479_s13 = sphi %s515_s13, %s647_s13   ;;  %s475_s12 = sphi %s513_s12, %s646_s12  }
   0x4   : > { %s538_s18 = sadd.s32 1, %s487_s15   ;;  %s91_s19 = sadd.s32 1, %s483_s14 }
   0x5   : > { %s88_s20 = ssub.s32 %s487_s15, %s538_s18  ;;  %p101_p0 = scmp.ne.s32.totalorder %s483_s14, %s479_s13 }
   0x6   : > { %p89_p1 = scmp.eq.s32.totalorder %s88_s20, 0  ;;  %p102_p2 = scmp.eq.s32.totalorder %s534_s16, 1 }
   0x7   : > { %p107_p3 = scmp.ne.s32.totalorder %s479_s13, %s475_s12  ;;  %p108_p4 = scmp.eq.s32.totalorder %s331_s17, 1 }
   0x8   : > { %s549_s21 = scalar_select %p89_p1, %s483_s14, %s91_s19  }
   0x9   : > { %p551_p5 = por %p102_p2, %p101_p0  ;;  %p555_p6 = por %p108_p4, %p107_p3 }
   0xa   : > { %p334_p7 = scmp.ge.s32.totalorder %s487_s15, 1  ;;  %p139_p8 = scmp.lt.s32.totalorder %s487_s15, 3 }
   0xc   : > { %p140_p9 = pnand %p334_p7, %p139_p8 }
   0xd   : > { %v167_v0 = vld [vmem:[%s641_s1] sm:$0xff] (!%p140_p9)  ;;  %v168_v1 = vld [vmem:[%s641_s1 + $0x8] sm:$0xff] (!%p140_p9)  ;;  %v169_v2 = vld [vmem:[%s641_s1 + $0x10] sm:$0xff] (!%p140_p9)  ;;  %v489_v3 = vmov (!%p140_p9), 0.0|0.0   ;;  %vm490_vm0 = vmmov (!%p140_p9), 0   ;;  %v491_v6 = vmov (!%p140_p9), 0.0  }
   0xe   : > { %143 = sbr.rel (%p140_p9) target bundleno = 259 (0x103), region = 32  ;;  %371 = vmatprep.subr.bf16.mxu0 (!%p140_p9), %v489_v3  ;;  %v372_v4 = vpack.c.bf16 (!%p140_p9), %v168_v1, %v167_v0  ;;  %v170_v5 = vld [vmem:[%s641_s1 + $0x18] sm:$0xff] (!%p140_p9)  ;;  %368 = vmatprep.mubr.msk.f32.mxu0 (!%p140_p9), %vm490_vm0, %v491_v6  ;;  %p162_p10 = scmp.lt.s32.totalorder (!%p140_p9), %s534_s16, 1  ;;  %v171_v8 = vld [vmem:[%s641_s1 + $0x20] sm:$0xff] (!%p140_p9)  ;;  %v172_v9 = vld [vmem:[%s641_s1 + $0x28] sm:$0xff] (!%p140_p9)  ;;  %vm182_vm1 = vcmask (!%p140_p9), 523264  }
   0xf   : > { %v375_v7 = vpack.c.bf16 (!%p140_p9), %v170_v5, %v169_v2  ;;  %v378_v10 = vpack.c.bf16 (!%p140_p9), %v172_v9, %v171_v8  ;;  %v173_v11 = vld [vmem:[%s641_s1 + $0x30] sm:$0xff] (!%p140_p9)  ;;  %v174_v12 = vld [vmem:[%s641_s1 + $0x38] sm:$0xff] (!%p140_p9)  ;;  %s159_s27 = sand.u32 (!%p140_p9), 1, %s479_s13   ;;  %v337_v15 = vld [vmem:[%s642_s2] ss:$0 sm:$0xff] (!%p140_p9)  ;;  %s340_s4 = sshll.u32 (!%p140_p9), %s534_s16, 7 }
  0x10   : > { %373 = vmatpush3.bf16.msra.mxu0 (!%p140_p9), %v372_v4  ;;  %v381_v13 = vpack.c.bf16 (!%p140_p9), %v174_v12, %v173_v11  ;;  %s335_s28 = sshll.u32 (!%p140_p9), %s159_s27, 3  ;;  %vm256_vm2 = vcmask (!%p140_p9), 261120   ;;  %s259_s10 = scalar_lea.sflag (!%p140_p9), [#allocation3], %s159_s27 }
  0x11   : > { %374 = vmatprep.subr.bf16.mxu0 (!%p140_p9), %v489_v3  ;;  %s161_s5 = scalar_lea.vmem (!%p140_p9), [#allocation2], %s335_s28 }
  0x12   : > { %s272_s6 = sshll.u32 (!%p140_p9), %s161_s5, 4  ;;  %s600_s6 = int_to_ptr.vmem [resolvable:$true] %s272_s6 }
  0x13   : > { %s425_s11 = scalar_lea.vmem (!%p140_p9), %s600_s6, 128 }
  0x14   : > { %376 = vmatpush3.bf16.msra.mxu0 (!%p140_p9), %v375_v7  ;;  %p426_p11 = scmp.ne.s32.totalorder (!%p140_p9), %s600_s6, %s425_s11 }
  0x15   : > { %s163_s9 = scalar_select %p162_p10, %s534_s16, 1  ;;  %377 = vmatprep.subr.bf16.mxu0 %v489_v3 }
  0x16   : > { %p427_p12 = pnand %p426_p11, %p551_p5  ;;  %s492_s16 = smov [#allocation2]  }
  0x17   : > { %s336_s20 = sshll.u32 %s163_s9, 3  ;;  %s598_s9 = scalar_lea.hbm %s643_s3, %s340_s4 }
  0x18   : > { %379 = vmatpush3.bf16.msra.mxu0 %v378_v10  ;;  %s165_s26 = scalar_lea.vmem %s640_s0, %s336_s20  ;;  %p428_p13 = pneg %p427_p12 }
  0x19   : > { %380 = vmatprep.subr.bf16.mxu0 %v489_v3  ;;  %v166_v14 = vld [vmem:[%s165_s26] sm:$0xff]  ;;  %s429_s17 = sshll.u32 %s492_s16, 4  ;;  %s430_s17 = int_to_ptr.vmem [resolvable:$false] %s429_s17 }
  0x1a   : > { %s431_s19 = scalar_lea.vmem %s430_s17, 256  ;;  %p432_p0 = scmp.lt.s32.totalorder %s600_s6, %s430_s17 }
  0x1b   : > { %p433_p1 = scmp.lt.s32.totalorder %s431_s19, %s425_s11 }
  0x1c   : > { %382 = vmatpush3.bf16.msra.mxu0 %v381_v13 }
  0x1d   : > { %p434_p2 = por %p433_p1, %p432_p0 }
  0x1f   : > { %369 = vmatmul.mubr.msk.f32.vlgmr.msra.gmra.mrb[0].mxu0 %vm182_vm1, %v166_v14  ;;  %p435_p3 = pnand %p434_p2, %p428_p13 }
  0xf2   : > { %v252_v16 = vpop.f32.mrb[0].mxu0 }
  0xf3   : > { %v253_v17 = vadd.f32 %v337_v15, %v252_v16  ;;  %v370_v18 = vpop.f32.mrb[1].mxu0 }
  0xf5   : > { %257 = vst.msk [vmem:[%s161_s5] sm:$0xff] %vm256_vm2, %v253_v17 }
  0xf6   : > { %438 = shalt.err (!%p435_p3)
}
  0xf7   : > { %s439_s20 = scalar_lea.hbm %s598_s9, 128  ;;  %s443_s26 = scalar_lea.hbm %s643_s3, 256 }
  0xf8   : > { %p440_p4 = scmp.ne.s32.totalorder %s598_s9, %s439_s20  ;;  %p444_p9 = scmp.lt.u32.totalorder %s598_s9, %s643_s3 }
  0xf9   : > { %p445_p10 = scmp.lt.u32.totalorder %s443_s26, %s439_s20  ;;  %p447_p12 = scmp.lt.u32.totalorder %s439_s20, %s598_s9 }
  0xfa   : > { %p441_p7 = pnand %p440_p4, %p551_p5 }
  0xfb   : > { %p446_p11 = por %p445_p10, %p444_p9 }
  0xfc   : > { %p442_p8 = pneg %p441_p7 }
  0xfd   : > { %p448_p13 = por %p447_p12, %p446_p11 }
  0xff   : > { %p449_p0 = pnand %p448_p13, %p442_p8 }
 0x101   : > { %452 = shalt.err (!%p449_p0)
}
 0x102   : > { %383 = dma.vmem_to_hbm [thread:$0]  (%p551_p5), %s600_s6, 128, %s598_s9, %s259_s10  }
 0x103 PF: > { %p389_p1 = scmp.ge.s32.totalorder %s487_s15, 2  ;;  %s284_s29 = sand.u32 1, %s475_s12  }
 0x104   : > { %s285_s30 = scalar_lea.sflag [#allocation3], %s284_s29 }
 0x105   : > { %p386_p2 = pnand %p389_p1, %p555_p6 }
 0x107   : > { %470 = dma.done.wait (!%p386_p2), %s285_s30, 128  }
 0x108   : > { %472 = vsyncadd (!%p386_p2), %s285_s30, 4294967168  ;;  %p13_p3 = scmp.ge.s32.totalorder %s538_s18, 4   ;;  %s646_s12 = smov %s479_s13 }
 0x109   : > { %s647_s13 = smov %s483_s14  ;;  %s648_s14 = smov %s549_s21 }
 0x10a   : > { %s649_s15 = smov %s538_s18  ;;  %15 = sbr.rel (!%p13_p3) target bundleno = 3 (0x3), region = 67 }
 0x111   :  { %290 = vsyncpa [#allocation3], 1 }
 0x112   :  { %292 = vsyncpa [#allocation3 + $0x1], 1 }

</bundles_post_ra>
